<compile_context>
chip_gen: v7x
topology: tpu7x:2x2x1
jax: 0.10.0
libtpu: 0.0.40
codegen_flags: <defaults>
</compile_context>

<pallas_src>
import jax
import jax.numpy as jnp
from jax.experimental import pallas as pl
from jax.experimental.pallas import tpu as pltpu

LANE = 128  # TPU lane width: hidden dim padded to a multiple of this (lane-dense h)


def _round_up(n, m):
    return ((n + m - 1) // m) * m


def mlp_kernel(x_ref, w1_ref, b1_ref, w2_ref, b2_ref, o_ref):
    # x_ref : (bm, F)   f32   (batch tile of squeezed input, pipelined)
    # w1_ref: (F, Hp)   f32   resident        b1_ref: (1, Hp) f32 resident
    # w2_ref: (Hp, O)   f32   resident        b2_ref: (1, O)  f32 resident
    # o_ref : (bm, O)   f32   (unpadded -> minimal HBM writeback, contiguous DMA)
    x = x_ref[...]
    h = jnp.dot(x, w1_ref[...], preferred_element_type=jnp.float32,
                precision=jax.lax.Precision.HIGHEST)            # MXU, ~f32 accuracy
    h = jnp.maximum(h + b1_ref[...], 0.0)                       # bias + ReLU on VPU
    y = jnp.dot(h, w2_ref[...], preferred_element_type=jnp.float32,
                precision=jax.lax.Precision.HIGHEST)            # MXU, ~f32 accuracy
    o_ref[...] = (y + b2_ref[...]).astype(o_ref.dtype)


def prepare_params(w1, b1, w2, b2):
    """One-time weight preparation (hoisted out of the per-forward path).

    Pads the hidden dim to a 128-lane multiple so h and both matmul N/K dims are
    lane-dense.  Padding is exact: b1 pad is 0, ReLU(0)=0, padded w2 rows are 0.
    The output dim is NOT padded (see header note on output write amplification).
    """
    F, H = w1.shape
    O = w2.shape[1]
    Hp = _round_up(H, LANE)
    w1p = jnp.pad(w1, ((0, 0), (0, Hp - H))).astype(jnp.float32)
    b1p = jnp.pad(b1, (0, Hp - H)).reshape(1, Hp).astype(jnp.float32)
    w2p = jnp.pad(w2, ((0, Hp - H), (0, 0))).astype(jnp.float32)
    b2p = b2.reshape(1, O).astype(jnp.float32)
    return w1p, b1p, w2p, b2p


def _pick_batch_tile(B, block_b):
    """Batch tile size.

    Big tiles amortize the ~0.35us per-grid-step cost; but when the batch allows it we
    also want >=4 tiles so v7x's two TensorCores each get >=2 pipelined steps of the
    'parallel' batch axis.  Tiles are multiples of 16 rows (sublane packing) unless the
    whole batch fits in one tile.
    """
    if B > 2 * block_b:
        return block_b
    bm = max(128, _round_up(pl.cdiv(B, 4), 16))   # aim for ~4 tiles, >=128 rows each
    bm = min(bm, block_b, _round_up(B, 8))
    return B if bm >= B else bm


def _build_call(x2d, w1p, b1p, w2p, b2p, bm, grid_b, single_buffer_weights):
    B, F = x2d.shape
    Hp = w1p.shape[1]
    O = w2p.shape[1]
    # Resident operands: constant index_map; single-buffer them (halves their VMEM
    # footprint — matters for the real wrf model on v7x's 64 MiB VMEM).
    resident_kw = {"pipeline_mode": pl.Buffered(1)} if single_buffer_weights else {}

    cost = pl.CostEstimate(
        flops=2 * B * F * Hp + 2 * B * Hp * O,
        transcendentals=0,
        bytes_accessed=(B * F * 4 + F * Hp * 4 + Hp * 4
                        + Hp * O * 4 + O * 4 + B * O * 4),
    )

    return pl.pallas_call(
        mlp_kernel,
        out_shape=jax.ShapeDtypeStruct((B, O), jnp.float32),
        grid_spec=pltpu.PrefetchScalarGridSpec(
            num_scalar_prefetch=0,
            grid=(grid_b,),
            in_specs=[
                pl.BlockSpec((bm, F), lambda i: (i, 0)),                  # x (pipelined)
                pl.BlockSpec((F, Hp), lambda i: (0, 0), **resident_kw),   # w1 (resident)
                pl.BlockSpec((1, Hp), lambda i: (0, 0), **resident_kw),   # b1 (resident)
                pl.BlockSpec((Hp, O), lambda i: (0, 0), **resident_kw),   # w2 (resident)
                pl.BlockSpec((1, O), lambda i: (0, 0), **resident_kw),    # b2 (resident)
            ],
            out_specs=pl.BlockSpec((bm, O), lambda i: (i, 0)),
        ),
        compiler_params=pltpu.CompilerParams(
            dimension_semantics=("parallel",),   # shards batch tiles over v7x's 2 TCs
        ),
        cost_estimate=cost,
    )(x2d, w1p, b1p, w2p, b2p)


def unsqueeze_module_forward(x, params, *, block_b=1024):
    """UnsqueezeModule.forward: squeeze(-1), then the inner MLP fused in one Pallas call.

    `params` must come from prepare_params() (one-time, outside the forward path).
    """
    assert x.shape[-1] == 1, "module expects a trailing size-1 dim"
    assert block_b % 8 == 0
    B = x.shape[0]

    # Layout-free removal of the trailing size-1 dim (bitcast, no copy).  x stays f32;
    # the kernel reads it directly (no wrapper-side dtype cast op).
    x2d = jax.lax.collapse(x, 1, 3).astype(jnp.float32)      # (B, F)

    bm = _pick_batch_tile(B, block_b)
    grid_b = pl.cdiv(B, bm)   # ragged last block is clamped by Pallas; still correct

    try:
        return _build_call(x2d, *params, bm, grid_b, True)
    except Exception:
        # Fallback for runtimes without single-buffer (pl.Buffered(1)) support;
        # identical math, weights just double-buffered.
        return _build_call(x2d, *params, bm, grid_b, False)


if __name__ == "__main__":
    # Small, module-consistent shapes: batch=8 WRF columns, features=32
    # (+ trailing singleton dim the module squeezes away), hidden=64, output=16.
    B, F, H, O = 8, 32, 64, 16

    key = jax.random.PRNGKey(0)
    kx, kw1, kb1, kw2, kb2 = jax.random.split(key, 5)

    x = jax.random.normal(kx, (B, F, 1), dtype=jnp.float32)   # module input
    # Deterministic synthetic parameters for the (unknown) inner model.
    w1 = jax.random.normal(kw1, (F, H), dtype=jnp.float32) * 0.1
    b1 = jax.random.normal(kb1, (H,), dtype=jnp.float32) * 0.1
    w2 = jax.random.normal(kw2, (H, O), dtype=jnp.float32) * 0.1
    b2 = jax.random.normal(kb2, (O,), dtype=jnp.float32) * 0.1

    params = prepare_params(w1, b1, w2, b2)   # one-time, hoisted out of forward

    y = unsqueeze_module_forward(x, params)
    y = jax.block_until_ready(y)

    # Pure-JAX f32 reference of the same math.
    x2d_ref = jnp.squeeze(x, axis=-1)
    y_ref = jnp.maximum(x2d_ref @ w1 + b1, 0.0) @ w2 + b2
    assert y.shape == (B, O)
    assert jnp.allclose(y, y_ref, atol=1e-2, rtol=1e-2), float(jnp.max(jnp.abs(y - y_ref)))

    # Ragged-last-tile check (review concern): B=24 with a 16-row tile -> 2 grid steps,
    # last block clamped to 8 rows; verify no garbage rows leak into the output.
    B2 = 24
    x2 = jax.random.normal(jax.random.PRNGKey(1), (B2, F, 1), dtype=jnp.float32)
    y2 = jax.block_until_ready(unsqueeze_module_forward(x2, params, block_b=16))
    y2_ref = jnp.maximum(jnp.squeeze(x2, axis=-1) @ w1 + b1, 0.0) @ w2 + b2
    assert y2.shape == (B2, O)
    assert jnp.allclose(y2, y2_ref, atol=1e-2, rtol=1e-2), float(jnp.max(jnp.abs(y2 - y2_ref)))

    print("KERNEL_OK")
</pallas_src>

<mosaic_0001>
module attributes {stable_mosaic.version = 11 : i64} {
  func.func @mlp_kernel(%arg0: i32, %arg1: memref<8x32xf32, #tpu.memory_space<vmem>>, %arg2: memref<32x128xf32, #tpu.memory_space<vmem>>, %arg3: memref<1x128xf32, #tpu.memory_space<vmem>>, %arg4: memref<128x16xf32, #tpu.memory_space<vmem>>, %arg5: memref<1x16xf32, #tpu.memory_space<vmem>>, %arg6: memref<8x16xf32, #tpu.memory_space<vmem>>) attributes {dimension_semantics = [#tpu.dimension_semantics<parallel>], iteration_bounds = array<i64: 1>, scalar_prefetch = 0 : i64, scratch_operands = 0 : i64, tpu.core_type = #tpu.core_type<tc>, window_params = [{transform_indices = @transform_0, window_bounds = array<i64: 8, 32>}, {pipeline_mode = #tpu.pipeline_mode<synchronous>, transform_indices = @transform_1, window_bounds = array<i64: 32, 128>}, {pipeline_mode = #tpu.pipeline_mode<synchronous>, transform_indices = @transform_2, window_bounds = array<i64: 1, 128>}, {pipeline_mode = #tpu.pipeline_mode<synchronous>, transform_indices = @transform_3, window_bounds = array<i64: 128, 16>}, {pipeline_mode = #tpu.pipeline_mode<synchronous>, transform_indices = @transform_4, window_bounds = array<i64: 1, 16>}, {transform_indices = @transform_5, window_bounds = array<i64: 8, 16>}]} {
    %c0 = arith.constant 0 : index
    %c0_0 = arith.constant 0 : index
    %0 = vector.load %arg1[%c0, %c0_0] : memref<8x32xf32, #tpu.memory_space<vmem>>, vector<8x32xf32>
    %c0_1 = arith.constant 0 : index
    %c0_2 = arith.constant 0 : index
    %1 = vector.load %arg2[%c0_1, %c0_2] : memref<32x128xf32, #tpu.memory_space<vmem>>, vector<32x128xf32>
    %cst = arith.constant dense<0.000000e+00> : vector<8x128xf32>
    %2 = tpu.matmul %0, %1, %cst {dimension_numbers = #tpu.dot_dimension_numbers<[1], [0], [0], [1], [0, 0, 1, 1], [], []>, precision = #tpu.contract_precision<fp32>} : vector<8x32xf32>, vector<32x128xf32>, vector<8x128xf32> -> vector<8x128xf32>
    %c0_3 = arith.constant 0 : index
    %c0_4 = arith.constant 0 : index
    %3 = vector.load %arg3[%c0_3, %c0_4] : memref<1x128xf32, #tpu.memory_space<vmem>>, vector<1x128xf32>
    %4 = vector.broadcast %3 : vector<1x128xf32> to vector<8x128xf32>
    %5 = arith.addf %2, %4 : vector<8x128xf32>
    %cst_5 = arith.constant 0.000000e+00 : f32
    %6 = vector.broadcast %cst_5 : f32 to vector<8x128xf32>
    %7 = arith.maximumf %5, %6 : vector<8x128xf32>
    %c0_6 = arith.constant 0 : index
    %c0_7 = arith.constant 0 : index
    %8 = vector.load %arg4[%c0_6, %c0_7] : memref<128x16xf32, #tpu.memory_space<vmem>>, vector<128x16xf32>
    %cst_8 = arith.constant dense<0.000000e+00> : vector<8x16xf32>
    %9 = tpu.matmul %7, %8, %cst_8 {dimension_numbers = #tpu.dot_dimension_numbers<[1], [0], [0], [1], [0, 0, 1, 1], [], []>, precision = #tpu.contract_precision<fp32>} : vector<8x128xf32>, vector<128x16xf32>, vector<8x16xf32> -> vector<8x16xf32>
    %c0_9 = arith.constant 0 : index
    %c0_10 = arith.constant 0 : index
    %10 = vector.load %arg5[%c0_9, %c0_10] : memref<1x16xf32, #tpu.memory_space<vmem>>, vector<1x16xf32>
    %11 = vector.broadcast %10 : vector<1x16xf32> to vector<8x16xf32>
    %12 = arith.addf %9, %11 : vector<8x16xf32>
    %c0_11 = arith.constant 0 : index
    %c0_12 = arith.constant 0 : index
    %13 = vector.load %arg6[%c0_11, %c0_12] : memref<8x16xf32, #tpu.memory_space<vmem>>, vector<8x16xf32>
    tpu.vector_store %arg6[%c0_11, %c0_12], %12 {strides = array<i32>} : memref<8x16xf32, #tpu.memory_space<vmem>>, vector<8x16xf32>,
    return
  }
  func.func @transform_0(%arg0: i32) -> (i32, i32) {
    %c0_i32 = arith.constant 0 : i32
    %c0_i32_0 = arith.constant 0 : i32
    return %arg0, %c0_i32 : i32, i32
  }
  func.func @transform_1(%arg0: i32) -> (i32, i32) {
    %c0_i32 = arith.constant 0 : i32
    %c0_i32_0 = arith.constant 0 : i32
    %c0_i32_1 = arith.constant 0 : i32
    return %c0_i32, %c0_i32_0 : i32, i32
  }
  func.func @transform_2(%arg0: i32) -> (i32, i32) {
    %c0_i32 = arith.constant 0 : i32
    %c0_i32_0 = arith.constant 0 : i32
    %c0_i32_1 = arith.constant 0 : i32
    return %c0_i32, %c0_i32_0 : i32, i32
  }
  func.func @transform_3(%arg0: i32) -> (i32, i32) {
    %c0_i32 = arith.constant 0 : i32
    %c0_i32_0 = arith.constant 0 : i32
    %c0_i32_1 = arith.constant 0 : i32
    return %c0_i32, %c0_i32_0 : i32, i32
  }
  func.func @transform_4(%arg0: i32) -> (i32, i32) {
    %c0_i32 = arith.constant 0 : i32
    %c0_i32_0 = arith.constant 0 : i32
    %c0_i32_1 = arith.constant 0 : i32
    return %c0_i32, %c0_i32_0 : i32, i32
  }
  func.func @transform_5(%arg0: i32) -> (i32, i32) {
    %c0_i32 = arith.constant 0 : i32
    %c0_i32_0 = arith.constant 0 : i32
    return %arg0, %c0_i32 : i32, i32
  }
}

module attributes {stable_mosaic.version = 11 : i64} {
  func.func @mlp_kernel(%arg0: i32, %arg1: memref<8x32xf32, #tpu.memory_space<vmem>>, %arg2: memref<32x128xf32, #tpu.memory_space<vmem>>, %arg3: memref<1x128xf32, #tpu.memory_space<vmem>>, %arg4: memref<128x16xf32, #tpu.memory_space<vmem>>, %arg5: memref<1x16xf32, #tpu.memory_space<vmem>>, %arg6: memref<8x16xf32, #tpu.memory_space<vmem>>) attributes {dimension_semantics = [#tpu.dimension_semantics<parallel>], iteration_bounds = array<i64: 1>, scalar_prefetch = 0 : i64, scratch_operands = 0 : i64, tpu.core_type = #tpu.core_type<tc>, window_params = [{transform_indices = @transform_0, window_bounds = array<i64: 8, 32>}, {pipeline_mode = #tpu.pipeline_mode<synchronous>, transform_indices = @transform_1, window_bounds = array<i64: 32, 128>}, {pipeline_mode = #tpu.pipeline_mode<synchronous>, transform_indices = @transform_2, window_bounds = array<i64: 1, 128>}, {pipeline_mode = #tpu.pipeline_mode<synchronous>, transform_indices = @transform_3, window_bounds = array<i64: 128, 16>}, {pipeline_mode = #tpu.pipeline_mode<synchronous>, transform_indices = @transform_4, window_bounds = array<i64: 1, 16>}, {transform_indices = @transform_5, window_bounds = array<i64: 8, 16>}]} {
    %c0 = arith.constant 0 : index
    %c0_0 = arith.constant 0 : index
    %0 = vector.load %arg1[%c0, %c0_0] : memref<8x32xf32, #tpu.memory_space<vmem>>, vector<8x32xf32>
    %c0_1 = arith.constant 0 : index
    %c0_2 = arith.constant 0 : index
    %1 = vector.load %arg2[%c0_1, %c0_2] : memref<32x128xf32, #tpu.memory_space<vmem>>, vector<32x128xf32>
    %cst = arith.constant dense<0.000000e+00> : vector<8x128xf32>
    %2 = tpu.matmul %0, %1, %cst {dimension_numbers = #tpu.dot_dimension_numbers<[1], [0], [0], [1], [0, 0, 1, 1], [], []>, precision = #tpu.contract_precision<fp32>} : vector<8x32xf32>, vector<32x128xf32>, vector<8x128xf32> -> vector<8x128xf32>
    %c0_3 = arith.constant 0 : index
    %c0_4 = arith.constant 0 : index
    %3 = vector.load %arg3[%c0_3, %c0_4] : memref<1x128xf32, #tpu.memory_space<vmem>>, vector<1x128xf32>
    %4 = vector.broadcast %3 : vector<1x128xf32> to vector<8x128xf32>
    %5 = arith.addf %2, %4 : vector<8x128xf32>
    %cst_5 = arith.constant 0.000000e+00 : f32
    %6 = vector.broadcast %cst_5 : f32 to vector<8x128xf32>
    %7 = arith.maximumf %5, %6 : vector<8x128xf32>
    %c0_6 = arith.constant 0 : index
    %c0_7 = arith.constant 0 : index
    %8 = vector.load %arg4[%c0_6, %c0_7] : memref<128x16xf32, #tpu.memory_space<vmem>>, vector<128x16xf32>
    %cst_8 = arith.constant dense<0.000000e+00> : vector<8x16xf32>
    %9 = tpu.matmul %7, %8, %cst_8 {dimension_numbers = #tpu.dot_dimension_numbers<[1], [0], [0], [1], [0, 0, 1, 1], [], []>, precision = #tpu.contract_precision<fp32>} : vector<8x128xf32>, vector<128x16xf32>, vector<8x16xf32> -> vector<8x16xf32>
    %c0_9 = arith.constant 0 : index
    %c0_10 = arith.constant 0 : index
    %10 = vector.load %arg5[%c0_9, %c0_10] : memref<1x16xf32, #tpu.memory_space<vmem>>, vector<1x16xf32>
    %11 = vector.broadcast %10 : vector<1x16xf32> to vector<8x16xf32>
    %12 = arith.addf %9, %11 : vector<8x16xf32>
    %c0_11 = arith.constant 0 : index
    %c0_12 = arith.constant 0 : index
    %13 = vector.load %arg6[%c0_11, %c0_12] : memref<8x16xf32, #tpu.memory_space<vmem>>, vector<8x16xf32>
    tpu.vector_store %arg6[%c0_11, %c0_12], %12 {strides = array<i32>} : memref<8x16xf32, #tpu.memory_space<vmem>>, vector<8x16xf32>,
    return
  }
  func.func @transform_0(%arg0: i32) -> (i32, i32) {
    %c0_i32 = arith.constant 0 : i32
    %c0_i32_0 = arith.constant 0 : i32
    return %arg0, %c0_i32 : i32, i32
  }
  func.func @transform_1(%arg0: i32) -> (i32, i32) {
    %c0_i32 = arith.constant 0 : i32
    %c0_i32_0 = arith.constant 0 : i32
    %c0_i32_1 = arith.constant 0 : i32
    return %c0_i32, %c0_i32_0 : i32, i32
  }
  func.func @transform_2(%arg0: i32) -> (i32, i32) {
    %c0_i32 = arith.constant 0 : i32
    %c0_i32_0 = arith.constant 0 : i32
    %c0_i32_1 = arith.constant 0 : i32
    return %c0_i32, %c0_i32_0 : i32, i32
  }
  func.func @transform_3(%arg0: i32) -> (i32, i32) {
    %c0_i32 = arith.constant 0 : i32
    %c0_i32_0 = arith.constant 0 : i32
    %c0_i32_1 = arith.constant 0 : i32
    return %c0_i32, %c0_i32_0 : i32, i32
  }
  func.func @transform_4(%arg0: i32) -> (i32, i32) {
    %c0_i32 = arith.constant 0 : i32
    %c0_i32_0 = arith.constant 0 : i32
    %c0_i32_1 = arith.constant 0 : i32
    return %c0_i32, %c0_i32_0 : i32, i32
  }
  func.func @transform_5(%arg0: i32) -> (i32, i32) {
    %c0_i32 = arith.constant 0 : i32
    %c0_i32_0 = arith.constant 0 : i32
    return %arg0, %c0_i32 : i32, i32
  }
}

</mosaic_0001>

<bundles_post_ra>
// kernel: tpu_custom_call.1
= control target key start
LH: loop header
LB: loop body
LE: loop exit
PB: predicated region body
PF: predicated region fallthrough
CT: control target
= control target key end

     0   :  { %v1842_v3 = vmov 0.0|0.0   ;;  %vm1843_vm0 = vmmov 0   ;;  %v1844_v8 = vmov 0.0   ;;  %vm33_vm1 = vcmask 261120   ;;  %s2357_s0 = inlined_call_operand.vmem [shape: f32[8,32], index: 0, kind: input, shape index: {}]   ;;  %s2358_s1 = inlined_call_operand.vmem [shape: f32[32,128], index: 1, kind: input, shape index: {}]   ;;  %s2359_s2 = inlined_call_operand.vmem [shape: f32[1,128], index: 2, kind: input, shape index: {}]   ;;  %s2360_s3 = inlined_call_operand.vmem [shape: f32[128,16], index: 3, kind: input, shape index: {}]   ;;  %s2361_s4 = inlined_call_operand.vmem [shape: f32[1,16], index: 4, kind: input, shape index: {}]   ;;  %s2362_s5 = inlined_call_operand.hbm [shape: f32[8,16], index: 5, kind: output, shape index: {}]  }
   0x1   :  { %v22_v0 = vld [vmem:[%s2358_s1] sm:$0xff]  ;;  %v23_v1 = vld [vmem:[%s2358_s1 + $0x8] sm:$0xff]  ;;  %v24_v2 = vld [vmem:[%s2358_s1 + $0x10] sm:$0xff]  ;;  %1613 = vmatprep.subr.bf16.mxu0 %v1842_v3  ;;  %1345 = vmatprep.mubr.msk.f32.mxu0 %vm1843_vm0, %v1844_v8 }
   0x2   :  { %v38_v4 = vand.u32 4294901760, %v22_v0  ;;  %v41_v5 = vand.u32 4294901760, %v23_v1  ;;  %v25_v6 = vld [vmem:[%s2358_s1 + $0x18] sm:$0xff]  ;;  %v44_v7 = vand.u32 4294901760, %v24_v2  ;;  %v21_v9 = vld [vmem:[%s2357_s0] sm:$0xff]  ;;  %1697 = vmatprep.subr.bf16.mxu1 %v1842_v3  ;;  %1505 = vmatprep.mubr.msk.f32.mxu1 %vm1843_vm0, %v1844_v8  ;;  %v1913_v17 = vld [vmem:[%s2360_s3 + $0x8] sm:$0xff] }
   0x3   :  { %v47_v10 = vand.u32 4294901760, %v25_v6  ;;  %v35_v11 = vsel %vm33_vm1, %v21_v9, 0  ;;  %v1898_v12 = vld [vmem:[%s2360_s3] sm:$0xff]  ;;  %v550_v27 = vand.u32 4294901760, %v1913_v17 }
   0x4   :  { %v1902_v13 = vpack.c.bf16 %v41_v5, %v38_v4  ;;  %v1904_v14 = vsub.f32 %v22_v0, %v38_v4  ;;  %v1906_v15 = vsub.f32 %v23_v1, %v41_v5  ;;  %v1908_v16 = vsub.f32 %v24_v2, %v44_v7 }
   0x5   :  { %v1915_v18 = vsub.f32 %v25_v6, %v47_v10  ;;  %v1917_v19 = vand.u32 4294901760, %v35_v11  ;;  %v547_v20 = vand.u32 4294901760, %v1898_v12  ;;  %v1921_v21 = vpack.c.bf16 %v47_v10, %v44_v7 }
   0x6   :  { %1615 = vmatpush3.bf16.msra.mxu0 %v1902_v13  ;;  %v119_v22 = vand.u32 4294901760, %v1904_v14  ;;  %v126_v23 = vand.u32 4294901760, %v1906_v15  ;;  %v133_v24 = vand.u32 4294901760, %v1908_v16 }
   0x7   :  { %1616 = vmatprep.subr.bf16.mxu0 %v1842_v3  ;;  %v1928_v25 = vsub.f32 %v35_v11, %v1917_v19  ;;  %v140_v26 = vand.u32 4294901760, %v1915_v18 }
   0x8   :  { %10 = vsyncpa [#allocation3], 0  ;;  %v120_v28 = vsub.f32 %v1904_v14, %v119_v22  ;;  %v127_v29 = vsub.f32 %v1906_v15, %v126_v23  ;;  %v134_v30 = vsub.f32 %v1908_v16, %v133_v24  ;;  %v1944_v31 = vld [vmem:[%s2360_s3 + $0x10] sm:$0xff]  ;;  %v1953_v34 = vsub.f32 %v1898_v12, %v547_v20  ;;  %v1958_v35 = vld [vmem:[%s2360_s3 + $0x18] sm:$0xff]  ;;  %s1845_s8 = smov [#allocation2]  }
   0x9   :  { %v108_v32 = vand.u32 4294901760, %v1928_v25  ;;  %v141_v33 = vsub.f32 %v1915_v18, %v140_v26  ;;  %v1964_v38 = vsub.f32 %v1913_v17, %v550_v27  ;;  %v553_v42 = vand.u32 4294901760, %v1944_v31  ;;  %v1974_v43 = vld [vmem:[%s2360_s3 + $0x20] sm:$0xff]  ;;  %v1979_v44 = vld [vmem:[%s2360_s3 + $0x28] sm:$0xff]  ;;  %v1987_v48 = vld [vmem:[%s2360_s3 + $0x30] sm:$0xff]  ;;  %s1195_s9 = sshll.u32 %s1845_s8, 4  ;;  %s1196_s9 = int_to_ptr.vmem [resolvable:$true] %s1195_s9 }
   0xa   :  { %1618 = vmatpush3.bf16.msra.mxu0 %v1921_v21  ;;  %v121_v36 = vand.u32 4294901760, %v120_v28  ;;  %v128_v37 = vand.u32 4294901760, %v127_v29  ;;  %v135_v40 = vand.u32 4294901760, %v134_v30  ;;  %v556_v47 = vand.u32 4294901760, %v1958_v35  ;;  %v1992_v49 = vld [vmem:[%s2360_s3 + $0x38] sm:$0xff]  ;;  %v2009_v55 = vld [vmem:[%s2360_s3 + $0x40] sm:$0xff]  ;;  %p1823_p1 = scmp.lt.s32.totalorder %s1196_s9, %s1196_s9 }
   0xb   :  { %v109_v39 = vsub.f32 %v1928_v25, %v108_v32  ;;  %1619 = vmatprep.subr.bf16.mxu0 %v1842_v3  ;;  %v142_v41 = vand.u32 4294901760, %v141_v33  ;;  %v1698_v46 = vpack.c.bf16 %v1964_v38, %v1953_v34  ;;  %v1997_v51 = vsub.f32 %v1944_v31, %v553_v42  ;;  %v2017_v59 = vld [vmem:[%s2360_s3 + $0x48] sm:$0xff]  ;;  %v2051_v5 = vld [vmem:[%s2360_s3 + $0x50] sm:$0xff]  ;;  %v2057_v6 = vld [vmem:[%s2360_s3 + $0x58] sm:$0xff]  ;;  %s1818_s10 = scalar_lea.vmem %s1196_s9, 128 }
   0xc   :  { %v1620_v45 = vpack.c.bf16 %v128_v37, %v121_v36  ;;  %v2002_v52 = vsub.f32 %v1958_v35, %v556_v47  ;;  %v559_v53 = vand.u32 4294901760, %v1974_v43  ;;  %v562_v54 = vand.u32 4294901760, %v1979_v44  ;;  %v535_v17 = vld [vmem:[%s2360_s3 + $0x60] sm:$0xff]  ;;  %p1819_p0 = scmp.ne.s32.totalorder %s1196_s9, %s1818_s10  ;;  %p1824_p2 = scmp.lt.s32.totalorder %s1818_s10, %s1818_s10 }
   0xd   :  { %v110_v50 = vand.u32 4294901760, %v109_v39  ;;  %1699 = vmatpush3.bf16.msra.mxu1 %v1698_v46  ;;  %v1623_v56 = vpack.c.bf16 %v142_v41, %v135_v40  ;;  %v565_v57 = vand.u32 4294901760, %v1987_v48  ;;  %v568_v58 = vand.u32 4294901760, %v1992_v49 }
   0xe   :  { %1700 = vmatprep.subr.bf16.mxu1 %v1842_v3  ;;  %v1701_v60 = vpack.c.bf16 %v2002_v52, %v1997_v51  ;;  %v2026_v61 = vsub.f32 %v1974_v43, %v559_v53  ;;  %v2031_v62 = vsub.f32 %v1979_v44, %v562_v54  ;;  %v571_v63 = vand.u32 4294901760, %v2009_v55  ;;  %p1825_p3 = por %p1824_p2, %p1823_p1 }
   0xf   :  { %1346 = vmatmul.mubr.f32.vlgmr.msra.gmra.mrb[0].mxu0 %v110_v50  ;;  %v2040_v1 = vsub.f32 %v1987_v48, %v565_v57  ;;  %v2045_v2 = vsub.f32 %v1992_v49, %v568_v58  ;;  %v574_v4 = vand.u32 4294901760, %v2017_v59  ;;  %v1626_v7 = vpack.c.bf16 %v1906_v15, %v1904_v14 }
  0x10   :  { %1621 = vmatpush3.bf16.msra.mxu0 %v1620_v45  ;;  %1356 = vmatprep.mubr.msk.f32.mxu0 %vm1843_vm0, %v1844_v8  ;;  %v1704_v0 = vpack.c.bf16 %v2031_v62, %v2026_v61  ;;  %v577_v9 = vand.u32 4294901760, %v2051_v5  ;;  %v2068_v11 = vsub.f32 %v2009_v55, %v571_v63  ;;  %v580_v29 = vand.u32 4294901760, %v2057_v6  ;;  %p1826_p4 = pnand %p1825_p3, %p1819_p0 }
  0x11   :  { %1622 = vmatprep.subr.bf16.mxu0 %v1842_v3  ;;  %1702 = vmatpush3.bf16.msra.mxu1 %v1701_v60  ;;  %v1707_v10 = vpack.c.bf16 %v2045_v2, %v2040_v1  ;;  %v2073_v28 = vsub.f32 %v2017_v59, %v574_v4  ;;  %v1629_v30 = vpack.c.bf16 %v1915_v18, %v1908_v16  ;;  %v536_v18 = vld [vmem:[%s2360_s3 + $0x68] sm:$0xff]  ;;  %vm1187_vm2 = vcmask 130048  }
  0x12   :  { %1703 = vmatprep.subr.bf16.mxu1 %v1842_v3  ;;  %v2088_v36 = vsub.f32 %v2051_v5, %v577_v9  ;;  %v2093_v37 = vsub.f32 %v2057_v6, %v580_v29  ;;  %v1638_v40 = vpack.c.bf16 %v126_v23, %v119_v22  ;;  %v1641_v41 = vpack.c.bf16 %v140_v26, %v133_v24  ;;  %v537_v23 = vld [vmem:[%s2360_s3 + $0x70] sm:$0xff]  ;;  %v538_v24 = vld [vmem:[%s2360_s3 + $0x78] sm:$0xff] }
  0x13   :  { %v1710_v33 = vpack.c.bf16 %v2073_v28, %v2068_v11  ;;  %v2132_v14 = vpack.c.bf16 %v550_v27, %v547_v20  ;;  %v2151_v12 = vpack.c.bf16 %v562_v54, %v559_v53  ;;  %v2159_v15 = vpack.c.bf16 %v568_v58, %v565_v57 }
  0x14   :  { %1624 = vmatpush3.bf16.msra.mxu0 %v1623_v56  ;;  %v1713_v39 = vpack.c.bf16 %v2093_v37, %v2088_v36  ;;  %v2167_v16 = vpack.c.bf16 %v574_v4, %v571_v63  ;;  %v586_v20 = vand.u32 4294901760, %v536_v18  ;;  %v589_v26 = vand.u32 4294901760, %v537_v23  ;;  %v1203_v4 = vld [vmem:[%s2359_s2] ss:$0 sm:$0xff] }
  0x15   :  { %1625 = vmatprep.subr.bf16.mxu0 %v1842_v3  ;;  %1705 = vmatpush3.bf16.msra.mxu1 %v1704_v0  ;;  %v592_v27 = vand.u32 4294901760, %v538_v24  ;;  %v2188_v31 = vpack.c.bf16 %v580_v29, %v577_v9  ;;  %v640_v5 = vand.u32 4294901760, %v1953_v34  ;;  %v647_v6 = vand.u32 4294901760, %v1964_v38 }
  0x16   :  { %1706 = vmatprep.subr.bf16.mxu1 %v1842_v3  ;;  %v730_v22 = vsub.f32 %v536_v18, %v586_v20 }
  0x17   :  { %1357 = vmatmul.mubr.f32.vlgmr.msra.gmra.mrb[0].mxu0 %v1917_v19  ;;  %v744_v35 = vsub.f32 %v538_v24, %v592_v27  ;;  %v2198_v44 = vpack.c.bf16 %v592_v27, %v589_v26 }
  0x18   :  { %1627 = vmatpush3.bf16.msra.mxu0 %v1626_v7  ;;  %1367 = vmatprep.mubr.msk.f32.mxu0 %vm1843_vm0, %v1844_v8  ;;  %v731_v46 = vand.u32 4294901760, %v730_v22 }
  0x19   :  { %1628 = vmatprep.subr.bf16.mxu0 %v1842_v3  ;;  %1708 = vmatpush3.bf16.msra.mxu1 %v1707_v10  ;;  %v745_v54 = vand.u32 4294901760, %v744_v35 }
  0x1a   :  { %1709 = vmatprep.subr.bf16.mxu1 %v1842_v3  ;;  %v732_v48 = vsub.f32 %v730_v22, %v731_v46 }
  0x1b   :  { %v746_v57 = vsub.f32 %v744_v35, %v745_v54 }
  0x1c   :  { %1630 = vmatpush3.bf16.msra.mxu0 %v1629_v30  ;;  %v733_v50 = vand.u32 4294901760, %v732_v48  ;;  %v641_v30 = vsub.f32 %v1953_v34, %v640_v5 }
  0x1d   :  { %1631 = vmatprep.subr.bf16.mxu0 %v1842_v3  ;;  %1711 = vmatpush3.bf16.msra.mxu1 %v1710_v33  ;;  %v747_v59 = vand.u32 4294901760, %v746_v57  ;;  %v648_v33 = vsub.f32 %v1964_v38, %v647_v6  ;;  %v703_v57 = vand.u32 4294901760, %v2073_v28 }
  0x1e   :  { %1712 = vmatprep.subr.bf16.mxu1 %v1842_v3 }
  0x1f   :  { %1368 = vmatmul.mubr.f32.vlgmr.msra.gmra.mrb[0].mxu0 %v1928_v25 }
  0x20   :  { %1633 = vmatpush3.bf16.msra.mxu0 %v1902_v13  ;;  %1378 = vmatprep.mubr.msk.f32.mxu0 %vm1843_vm0, %v1844_v8 }
  0x21   :  { %1634 = vmatprep.subr.bf16.mxu0 %v1842_v3  ;;  %1714 = vmatpush3.bf16.msra.mxu1 %v1713_v39  ;;  %v654_v39 = vand.u32 4294901760, %v1997_v51 }
  0x22   :  { %1715 = vmatprep.subr.bf16.mxu1 %v1842_v3 }
  0x24   :  { %1636 = vmatpush3.bf16.msra.mxu0 %v1921_v21 }
  0x25   :  { %1637 = vmatprep.subr.bf16.mxu0 %v1842_v3 }
  0x27   :  { %1379 = vmatmul.mubr.f32.vlgmr.msra.gmra.mrb[0].mxu0 %v108_v32  ;;  %v737_v32 = vsub.f32 %v537_v23, %v589_v26 }
  0x28   :  { %1639 = vmatpush3.bf16.msra.mxu0 %v1638_v40  ;;  %1389 = vmatprep.mubr.msk.f32.mxu0 %vm1843_vm0, %v1844_v8  ;;  %v661_v40 = vand.u32 4294901760, %v2002_v52 }
  0x29   :  { %1640 = vmatprep.subr.bf16.mxu0 %v1842_v3  ;;  %v738_v53 = vand.u32 4294901760, %v737_v32 }
  0x2a   :  { %v662_v23 = vsub.f32 %v2002_v52, %v661_v40 }
  0x2b   :  { %v739_v56 = vsub.f32 %v737_v32, %v738_v53  ;;  %v2208_v0 = vpack.c.bf16 %v745_v54, %v738_v53 }
  0x2c   :  { %1642 = vmatpush3.bf16.msra.mxu0 %v1641_v41 }
  0x2d   :  { %1643 = vmatprep.subr.bf16.mxu0 %v1842_v3  ;;  %v740_v58 = vand.u32 4294901760, %v739_v56  ;;  %v696_v56 = vand.u32 4294901760, %v2068_v11 }
  0x2f   :  { %1390 = vmatmul.mubr.f32.vlgmr.msra.gmra.mrb[0].mxu0 %v1917_v19  ;;  %v2204_v60 = vpack.c.bf16 %v747_v59, %v740_v58 }
  0x30   :  { %1645 = vmatpush3.bf16.msra.mxu0 %v1902_v13  ;;  %1400 = vmatprep.mubr.msk.f32.mxu0 %vm1843_vm0, %v1844_v8  ;;  %v2141_v13 = vpack.c.bf16 %v556_v47, %v553_v42  ;;  %v1719_v42 = vpack.c.bf16 %v744_v35, %v737_v32  ;;  %v682_v32 = vand.u32 4294901760, %v2040_v1  ;;  %v689_v35 = vand.u32 4294901760, %v2045_v2 }
  0x31   :  { %1646 = vmatprep.subr.bf16.mxu0 %v1842_v3 }
  0x32   :  { %v690_v53 = vsub.f32 %v2045_v2, %v689_v35  ;;  %v1755_v38 = vpack.c.bf16 %v689_v35, %v682_v32 }
  0x34   :  { %1648 = vmatpush3.bf16.msra.mxu0 %v1921_v21 }
  0x35   :  { %1649 = vmatprep.subr.bf16.mxu0 %v1842_v3 }
  0x37   :  { %1401 = vmatmul.mubr.f32.vlgmr.msra.gmra.mrb[0].mxu0 %v1917_v19  ;;  %v583_v19 = vand.u32 4294901760, %v535_v17 }
  0x38   :  { %1651 = vmatpush3.bf16.msra.mxu0 %v2132_v14  ;;  %1435 = vmatprep.mubr.msk.f32.mxu0 %vm1843_vm0, %v1844_v8 }
  0x39   :  { %1652 = vmatprep.subr.bf16.mxu0 %v1842_v3  ;;  %v723_v21 = vsub.f32 %v535_v17, %v583_v19  ;;  %v2193_v43 = vpack.c.bf16 %v586_v20, %v583_v19  ;;  %v668_v17 = vand.u32 4294901760, %v2026_v61  ;;  %v675_v19 = vand.u32 4294901760, %v2031_v62 }
  0x3a   :  { %v642_v20 = vand.u32 4294901760, %v641_v30 }
  0x3b   :  { %v1716_v25 = vpack.c.bf16 %v730_v22, %v723_v21  ;;  %v724_v45 = vand.u32 4294901760, %v723_v21  ;;  %v655_v22 = vsub.f32 %v1997_v51, %v654_v39  ;;  %v676_v27 = vsub.f32 %v2031_v62, %v675_v19  ;;  %v1204_v62 = vld [vmem:[%s2361_s4] ss:$0 sm:$0xff] }
  0x3c   :  { %1654 = vmatpush3.bf16.msra.mxu0 %v2141_v13  ;;  %v1752_v34 = vpack.c.bf16 %v675_v19, %v668_v17  ;;  %v1758_v51 = vpack.c.bf16 %v703_v57, %v696_v56 }
  0x3d   :  { %1655 = vmatprep.subr.bf16.mxu0 %v1842_v3  ;;  %1717 = vmatpush3.bf16.msra.mxu1 %v1716_v25  ;;  %v725_v47 = vsub.f32 %v723_v21, %v724_v45  ;;  %v2206_v63 = vpack.c.bf16 %v731_v46, %v724_v45  ;;  %v649_v21 = vand.u32 4294901760, %v648_v33  ;;  %v669_v25 = vsub.f32 %v2026_v61, %v668_v17 }
  0x3e   :  { %1718 = vmatprep.subr.bf16.mxu1 %v1842_v3  ;;  %v656_v45 = vand.u32 4294901760, %v655_v22  ;;  %v663_v46 = vand.u32 4294901760, %v662_v23 }
  0x3f   :  { %v726_v49 = vand.u32 4294901760, %v725_v47  ;;  %v670_v48 = vand.u32 4294901760, %v669_v25  ;;  %v1749_v25 = vpack.c.bf16 %v661_v40, %v654_v39 }
  0x40   :  { %1657 = vmatpush3.bf16.msra.mxu0 %v2151_v12  ;;  %v1677_v54 = vpack.c.bf16 %v663_v46, %v656_v45 }
  0x41   :  { %1658 = vmatprep.subr.bf16.mxu0 %v1842_v3  ;;  %1720 = vmatpush3.bf16.msra.mxu1 %v1719_v42  ;;  %v2202_v55 = vpack.c.bf16 %v733_v50, %v726_v49  ;;  %v1674_v42 = vpack.c.bf16 %v649_v21, %v642_v20  ;;  %v677_v49 = vand.u32 4294901760, %v676_v27  ;;  %v683_v50 = vsub.f32 %v2040_v1, %v682_v32 }
  0x42   :  { %1721 = vmatprep.subr.bf16.mxu1 %v1842_v3 }
  0x43   :  { %v1680_v58 = vpack.c.bf16 %v677_v49, %v670_v48  ;;  %v684_v59 = vand.u32 4294901760, %v683_v50 }
  0x44   :  { %1660 = vmatpush3.bf16.msra.mxu0 %v2159_v15 }
  0x45   :  { %1661 = vmatprep.subr.bf16.mxu0 %v1842_v3 }
  0x48   :  { %1663 = vmatpush3.bf16.msra.mxu0 %v2167_v16 }
  0x49   :  { %1664 = vmatprep.subr.bf16.mxu0 %v1842_v3 }
  0x4c   :  { %1666 = vmatpush3.bf16.msra.mxu0 %v2188_v31 }
  0x4d   :  { %1667 = vmatprep.subr.bf16.mxu0 %v1842_v3 }
  0x50   :  { %1669 = vmatpush3.bf16.msra.mxu0 %v2193_v43 }
  0x51   :  { %1670 = vmatprep.subr.bf16.mxu0 %v1842_v3 }
  0x54   :  { %1672 = vmatpush3.bf16.msra.mxu0 %v2198_v44 }
  0x55   :  { %1673 = vmatprep.subr.bf16.mxu0 %v1842_v3 }
 0x10a   :  { %v518_v7 = vpop.f32.mrb[0].mxu0 }
 0x10b   :  { %v1793_v9 = vadd.f32 %v1203_v4, %v518_v7  ;;  %v1402_v10 = vpop.f32.mrb[1].mxu0  ;;  %v691_v4 = vand.u32 4294901760, %v690_v53  ;;  %v697_v7 = vsub.f32 %v2068_v11, %v696_v56 }
 0x10c   :  { %v710_v10 = vand.u32 4294901760, %v2088_v36 }
 0x10d   :  { %v522_v29 = vmax.f32 %v1793_v9, 0.0  ;;  %v704_v9 = vsub.f32 %v2073_v28, %v703_v57  ;;  %v1683_v30 = vpack.c.bf16 %v691_v4, %v684_v59  ;;  %v698_v33 = vand.u32 4294901760, %v697_v7 }
 0x10e   :  { %v711_v21 = vsub.f32 %v2088_v36, %v710_v10 }
 0x10f   :  { %v2223_v41 = vand.u32 4294901760, %v522_v29  ;;  %v705_v20 = vand.u32 4294901760, %v704_v9 }
 0x110   :  { %v712_v22 = vand.u32 4294901760, %v711_v21 }
 0x111   :  { %v2227_v18 = vsub.f32 %v522_v29, %v2223_v41  ;;  %v717_v29 = vand.u32 4294901760, %v2093_v37  ;;  %v1686_v28 = vpack.c.bf16 %v705_v20, %v698_v33 }
 0x113   :  { %v629_v24 = vand.u32 4294901760, %v2227_v18  ;;  %1506 = vmatmul.mubr.f32.vlgmr.msra.gmra.mrb[0].mxu1 %v2227_v18  ;;  %v718_v11 = vsub.f32 %v2093_v37, %v717_v29  ;;  %v1746_v37 = vpack.c.bf16 %v647_v6, %v640_v5  ;;  %v1761_v52 = vpack.c.bf16 %v717_v29, %v710_v10 }
 0x114   :  { %1723 = vmatpush3.bf16.msra.mxu1 %v2132_v14  ;;  %1540 = vmatprep.mubr.msk.f32.mxu1 %vm1843_vm0, %v1844_v8 }
 0x115   :  { %v630_v26 = vsub.f32 %v2227_v18, %v629_v24  ;;  %1724 = vmatprep.subr.bf16.mxu1 %v1842_v3  ;;  %v719_v23 = vand.u32 4294901760, %v718_v11 }
 0x117   :  { %v631_v47 = vand.u32 4294901760, %v630_v26  ;;  %v1689_v36 = vpack.c.bf16 %v719_v23, %v712_v22 }
 0x118   :  { %1726 = vmatpush3.bf16.msra.mxu1 %v2141_v13 }
 0x119   :  { %1436 = vmatmul.mubr.f32.vlgmr.msra.gmra.mrb[2].mxu0 %v631_v47  ;;  %1727 = vmatprep.subr.bf16.mxu1 %v1842_v3 }
 0x11a   :  { %1675 = vmatpush3.bf16.msra.mxu0 %v1674_v42  ;;  %1470 = vmatprep.mubr.msk.f32.mxu0 %vm1843_vm0, %v1844_v8 }
 0x11b   :  { %1676 = vmatprep.subr.bf16.mxu0 %v1842_v3 }
 0x11c   :  { %1729 = vmatpush3.bf16.msra.mxu1 %v2151_v12 }
 0x11d   :  { %1730 = vmatprep.subr.bf16.mxu1 %v1842_v3 }
 0x11e   :  { %1678 = vmatpush3.bf16.msra.mxu0 %v1677_v54 }
 0x11f   :  { %1679 = vmatprep.subr.bf16.mxu0 %v1842_v3 }
 0x120   :  { %1732 = vmatpush3.bf16.msra.mxu1 %v2159_v15 }
 0x121   :  { %1733 = vmatprep.subr.bf16.mxu1 %v1842_v3 }
 0x122   :  { %1681 = vmatpush3.bf16.msra.mxu0 %v1680_v58 }
 0x123   :  { %1682 = vmatprep.subr.bf16.mxu0 %v1842_v3 }
 0x124   :  { %1735 = vmatpush3.bf16.msra.mxu1 %v2167_v16 }
 0x125   :  { %1736 = vmatprep.subr.bf16.mxu1 %v1842_v3 }
 0x126   :  { %1684 = vmatpush3.bf16.msra.mxu0 %v1683_v30 }
 0x127   :  { %1685 = vmatprep.subr.bf16.mxu0 %v1842_v3 }
 0x128   :  { %1738 = vmatpush3.bf16.msra.mxu1 %v2188_v31 }
 0x129   :  { %1739 = vmatprep.subr.bf16.mxu1 %v1842_v3 }
 0x12a   :  { %1687 = vmatpush3.bf16.msra.mxu0 %v1686_v28 }
 0x12b   :  { %1688 = vmatprep.subr.bf16.mxu0 %v1842_v3 }
 0x12c   :  { %1741 = vmatpush3.bf16.msra.mxu1 %v2193_v43 }
 0x12d   :  { %1742 = vmatprep.subr.bf16.mxu1 %v1842_v3 }
 0x12e   :  { %1690 = vmatpush3.bf16.msra.mxu0 %v1689_v36 }
 0x12f   :  { %1691 = vmatprep.subr.bf16.mxu0 %v1842_v3 }
 0x130   :  { %1744 = vmatpush3.bf16.msra.mxu1 %v2198_v44 }
 0x131   :  { %1745 = vmatprep.subr.bf16.mxu1 %v1842_v3 }
 0x132   :  { %1693 = vmatpush3.bf16.msra.mxu0 %v2202_v55 }
 0x133   :  { %1541 = vmatmul.mubr.f32.vlgmr.msra.gmra.mrb[0].mxu1 %v629_v24  ;;  %1694 = vmatprep.subr.bf16.mxu0 %v1842_v3 }
 0x134   :  { %1747 = vmatpush3.bf16.msra.mxu1 %v1746_v37  ;;  %1575 = vmatprep.mubr.msk.f32.mxu1 %vm1843_vm0, %v1844_v8 }
 0x135   :  { %1748 = vmatprep.subr.bf16.mxu1 %v1842_v3 }
 0x136   :  { %1696 = vmatpush3.bf16.msra.mxu0 %v2204_v60 }
 0x138   :  { %1750 = vmatpush3.bf16.msra.mxu1 %v1749_v25 }
 0x139   :  { %1471 = vmatmul.mubr.f32.vlgmr.msra.gmra.mrb[2].mxu0 %v2223_v41  ;;  %1751 = vmatprep.subr.bf16.mxu1 %v1842_v3 }
 0x13c   :  { %1753 = vmatpush3.bf16.msra.mxu1 %v1752_v34 }
 0x13d   :  { %1754 = vmatprep.subr.bf16.mxu1 %v1842_v3 }
 0x140   :  { %1756 = vmatpush3.bf16.msra.mxu1 %v1755_v38 }
 0x141   :  { %1757 = vmatprep.subr.bf16.mxu1 %v1842_v3 }
 0x144   :  { %1759 = vmatpush3.bf16.msra.mxu1 %v1758_v51 }
 0x145   :  { %1760 = vmatprep.subr.bf16.mxu1 %v1842_v3 }
 0x148   :  { %1762 = vmatpush3.bf16.msra.mxu1 %v1761_v52 }
 0x149   :  { %1763 = vmatprep.subr.bf16.mxu1 %v1842_v3 }
 0x14c   :  { %1765 = vmatpush3.bf16.msra.mxu1 %v2206_v63 }
 0x14d   :  { %1766 = vmatprep.subr.bf16.mxu1 %v1842_v3 }
 0x150   :  { %1768 = vmatpush3.bf16.msra.mxu1 %v2208_v0 }
 0x151   :  { %1769 = vmatprep.subr.bf16.mxu1 %v1842_v3 }
 0x153   :  { %1576 = vmatmul.mubr.f32.vlgmr.msra.gmra.mrb[0].mxu1 %v2223_v41 }
 0x154   :  { %1771 = vmatpush3.bf16.msra.mxu1 %v2132_v14  ;;  %1610 = vmatprep.mubr.msk.f32.mxu1 %vm1843_vm0, %v1844_v8 }
 0x155   :  { %1772 = vmatprep.subr.bf16.mxu1 %v1842_v3 }
 0x158   :  { %1774 = vmatpush3.bf16.msra.mxu1 %v2141_v13 }
 0x159   :  { %1775 = vmatprep.subr.bf16.mxu1 %v1842_v3 }
 0x15c   :  { %1777 = vmatpush3.bf16.msra.mxu1 %v2151_v12 }
 0x15d   :  { %1778 = vmatprep.subr.bf16.mxu1 %v1842_v3 }
 0x160   :  { %1780 = vmatpush3.bf16.msra.mxu1 %v2159_v15 }
 0x161   :  { %1781 = vmatprep.subr.bf16.mxu1 %v1842_v3 }
 0x164   :  { %1783 = vmatpush3.bf16.msra.mxu1 %v2167_v16 }
 0x165   :  { %1784 = vmatprep.subr.bf16.mxu1 %v1842_v3 }
 0x168   :  { %1786 = vmatpush3.bf16.msra.mxu1 %v2188_v31 }
 0x169   :  { %1787 = vmatprep.subr.bf16.mxu1 %v1842_v3 }
 0x16c   :  { %1789 = vmatpush3.bf16.msra.mxu1 %v2193_v43 }
 0x16d   :  { %1790 = vmatprep.subr.bf16.mxu1 %v1842_v3 }
 0x170   :  { %1792 = vmatpush3.bf16.msra.mxu1 %v2198_v44 }
 0x173   :  { %1611 = vmatmul.mubr.f32.vlgmr.msra.gmra.mrb[0].mxu1 %v2223_v41 }
 0x20c   :  { %v784_v8 = vpop.f32.mrb[2].mxu0 }
 0x20d   :  { %v1472_v61 = vpop.f32.mrb[3].mxu0  ;;  %v1794_v1 = vadd.f32 %v1204_v62, %v784_v8 }
 0x246   :  { %v1183_v2 = vpop.f32.mrb[0].mxu1 }
 0x247   :  { %v1795_v14 = vadd.f32 %v1794_v1, %v1183_v2  ;;  %v1612_v13 = vpop.f32.mrb[1].mxu1 }
 0x249   :  { %1188 = vst.msk [vmem:[#allocation2] sm:$0xff] %vm1187_vm2, %v1795_v14 }
 0x24a   :  { %1829 = shalt.err (!%p1826_p4)
}
 0x24b   :  { %s1830_s4 = scalar_lea.hbm %s2362_s5, 128 }
 0x24c   :  { %p1831_p5 = scmp.ne.s32.totalorder %s2362_s5, %s1830_s4  ;;  %p1834_p6 = scmp.lt.u32.totalorder %s1830_s4, %s2362_s5 }
 0x24e   :  { %p1836_p7 = pnand %p1834_p6, %p1831_p5 }
 0x250   :  { %1839 = shalt.err (!%p1836_p7)
}
 0x251   :  { %1198 = dma.vmem_to_hbm [thread:$0]  %s1196_s9, 128, %s2362_s5, [#allocation3]  }
 0x252   :  { %1840 = dma.done.wait [#allocation3], 128  }
 0x253   :  { %1841 = vsyncadd [#allocation3], 4294967168 }
 0x254   :  { %1202 = vsyncpa [#allocation3], 1 }

// kernel: tpu_custom_call.1
= control target key start
LH: loop header
LB: loop body
LE: loop exit
PB: predicated region body
PF: predicated region fallthrough
CT: control target
= control target key end

     0   :  { %v1842_v3 = vmov 0.0|0.0   ;;  %vm1843_vm0 = vmmov 0   ;;  %v1844_v8 = vmov 0.0   ;;  %vm33_vm1 = vcmask 261120   ;;  %s2357_s0 = inlined_call_operand.vmem [shape: f32[8,32], index: 0, kind: input, shape index: {}]   ;;  %s2358_s1 = inlined_call_operand.vmem [shape: f32[32,128], index: 1, kind: input, shape index: {}]   ;;  %s2359_s2 = inlined_call_operand.vmem [shape: f32[1,128], index: 2, kind: input, shape index: {}]   ;;  %s2360_s3 = inlined_call_operand.vmem [shape: f32[128,16], index: 3, kind: input, shape index: {}]   ;;  %s2361_s4 = inlined_call_operand.vmem [shape: f32[1,16], index: 4, kind: input, shape index: {}]   ;;  %s2362_s5 = inlined_call_operand.hbm [shape: f32[8,16], index: 5, kind: output, shape index: {}]  }
   0x1   :  { %v22_v0 = vld [vmem:[%s2358_s1] sm:$0xff]  ;;  %v23_v1 = vld [vmem:[%s2358_s1 + $0x8] sm:$0xff]  ;;  %v24_v2 = vld [vmem:[%s2358_s1 + $0x10] sm:$0xff]  ;;  %1613 = vmatprep.subr.bf16.mxu0 %v1842_v3  ;;  %1345 = vmatprep.mubr.msk.f32.mxu0 %vm1843_vm0, %v1844_v8 }
   0x2   :  { %v38_v4 = vand.u32 4294901760, %v22_v0  ;;  %v41_v5 = vand.u32 4294901760, %v23_v1  ;;  %v25_v6 = vld [vmem:[%s2358_s1 + $0x18] sm:$0xff]  ;;  %v44_v7 = vand.u32 4294901760, %v24_v2  ;;  %v21_v9 = vld [vmem:[%s2357_s0] sm:$0xff]  ;;  %1697 = vmatprep.subr.bf16.mxu1 %v1842_v3  ;;  %1505 = vmatprep.mubr.msk.f32.mxu1 %vm1843_vm0, %v1844_v8  ;;  %v1913_v17 = vld [vmem:[%s2360_s3 + $0x8] sm:$0xff] }
   0x3   :  { %v47_v10 = vand.u32 4294901760, %v25_v6  ;;  %v35_v11 = vsel %vm33_vm1, %v21_v9, 0  ;;  %v1898_v12 = vld [vmem:[%s2360_s3] sm:$0xff]  ;;  %v550_v27 = vand.u32 4294901760, %v1913_v17 }
   0x4   :  { %v1902_v13 = vpack.c.bf16 %v41_v5, %v38_v4  ;;  %v1904_v14 = vsub.f32 %v22_v0, %v38_v4  ;;  %v1906_v15 = vsub.f32 %v23_v1, %v41_v5  ;;  %v1908_v16 = vsub.f32 %v24_v2, %v44_v7 }
   0x5   :  { %v1915_v18 = vsub.f32 %v25_v6, %v47_v10  ;;  %v1917_v19 = vand.u32 4294901760, %v35_v11  ;;  %v547_v20 = vand.u32 4294901760, %v1898_v12  ;;  %v1921_v21 = vpack.c.bf16 %v47_v10, %v44_v7 }
   0x6   :  { %1615 = vmatpush3.bf16.msra.mxu0 %v1902_v13  ;;  %v119_v22 = vand.u32 4294901760, %v1904_v14  ;;  %v126_v23 = vand.u32 4294901760, %v1906_v15  ;;  %v133_v24 = vand.u32 4294901760, %v1908_v16 }
   0x7   :  { %1616 = vmatprep.subr.bf16.mxu0 %v1842_v3  ;;  %v1928_v25 = vsub.f32 %v35_v11, %v1917_v19  ;;  %v140_v26 = vand.u32 4294901760, %v1915_v18 }
   0x8   :  { %10 = vsyncpa [#allocation3], 0  ;;  %v120_v28 = vsub.f32 %v1904_v14, %v119_v22  ;;  %v127_v29 = vsub.f32 %v1906_v15, %v126_v23  ;;  %v134_v30 = vsub.f32 %v1908_v16, %v133_v24  ;;  %v1944_v31 = vld [vmem:[%s2360_s3 + $0x10] sm:$0xff]  ;;  %v1953_v34 = vsub.f32 %v1898_v12, %v547_v20  ;;  %v1958_v35 = vld [vmem:[%s2360_s3 + $0x18] sm:$0xff]  ;;  %s1845_s8 = smov [#allocation2]  }
   0x9   :  { %v108_v32 = vand.u32 4294901760, %v1928_v25  ;;  %v141_v33 = vsub.f32 %v1915_v18, %v140_v26  ;;  %v1964_v38 = vsub.f32 %v1913_v17, %v550_v27  ;;  %v553_v42 = vand.u32 4294901760, %v1944_v31  ;;  %v1974_v43 = vld [vmem:[%s2360_s3 + $0x20] sm:$0xff]  ;;  %v1979_v44 = vld [vmem:[%s2360_s3 + $0x28] sm:$0xff]  ;;  %v1987_v48 = vld [vmem:[%s2360_s3 + $0x30] sm:$0xff]  ;;  %s1195_s9 = sshll.u32 %s1845_s8, 4  ;;  %s1196_s9 = int_to_ptr.vmem [resolvable:$true] %s1195_s9 }
   0xa   :  { %1618 = vmatpush3.bf16.msra.mxu0 %v1921_v21  ;;  %v121_v36 = vand.u32 4294901760, %v120_v28  ;;  %v128_v37 = vand.u32 4294901760, %v127_v29  ;;  %v135_v40 = vand.u32 4294901760, %v134_v30  ;;  %v556_v47 = vand.u32 4294901760, %v1958_v35  ;;  %v1992_v49 = vld [vmem:[%s2360_s3 + $0x38] sm:$0xff]  ;;  %v2009_v55 = vld [vmem:[%s2360_s3 + $0x40] sm:$0xff]  ;;  %p1823_p1 = scmp.lt.s32.totalorder %s1196_s9, %s1196_s9 }
   0xb   :  { %v109_v39 = vsub.f32 %v1928_v25, %v108_v32  ;;  %1619 = vmatprep.subr.bf16.mxu0 %v1842_v3  ;;  %v142_v41 = vand.u32 4294901760, %v141_v33  ;;  %v1698_v46 = vpack.c.bf16 %v1964_v38, %v1953_v34  ;;  %v1997_v51 = vsub.f32 %v1944_v31, %v553_v42  ;;  %v2017_v59 = vld [vmem:[%s2360_s3 + $0x48] sm:$0xff]  ;;  %v2051_v5 = vld [vmem:[%s2360_s3 + $0x50] sm:$0xff]  ;;  %v2057_v6 = vld [vmem:[%s2360_s3 + $0x58] sm:$0xff]  ;;  %s1818_s10 = scalar_lea.vmem %s1196_s9, 128 }
   0xc   :  { %v1620_v45 = vpack.c.bf16 %v128_v37, %v121_v36  ;;  %v2002_v52 = vsub.f32 %v1958_v35, %v556_v47  ;;  %v559_v53 = vand.u32 4294901760, %v1974_v43  ;;  %v562_v54 = vand.u32 4294901760, %v1979_v44  ;;  %v535_v17 = vld [vmem:[%s2360_s3 + $0x60] sm:$0xff]  ;;  %p1819_p0 = scmp.ne.s32.totalorder %s1196_s9, %s1818_s10  ;;  %p1824_p2 = scmp.lt.s32.totalorder %s1818_s10, %s1818_s10 }
   0xd   :  { %v110_v50 = vand.u32 4294901760, %v109_v39  ;;  %1699 = vmatpush3.bf16.msra.mxu1 %v1698_v46  ;;  %v1623_v56 = vpack.c.bf16 %v142_v41, %v135_v40  ;;  %v565_v57 = vand.u32 4294901760, %v1987_v48  ;;  %v568_v58 = vand.u32 4294901760, %v1992_v49 }
   0xe   :  { %1700 = vmatprep.subr.bf16.mxu1 %v1842_v3  ;;  %v1701_v60 = vpack.c.bf16 %v2002_v52, %v1997_v51  ;;  %v2026_v61 = vsub.f32 %v1974_v43, %v559_v53  ;;  %v2031_v62 = vsub.f32 %v1979_v44, %v562_v54  ;;  %v571_v63 = vand.u32 4294901760, %v2009_v55  ;;  %p1825_p3 = por %p1824_p2, %p1823_p1 }
   0xf   :  { %1346 = vmatmul.mubr.f32.vlgmr.msra.gmra.mrb[0].mxu0 %v110_v50  ;;  %v2040_v1 = vsub.f32 %v1987_v48, %v565_v57  ;;  %v2045_v2 = vsub.f32 %v1992_v49, %v568_v58  ;;  %v574_v4 = vand.u32 4294901760, %v2017_v59  ;;  %v1626_v7 = vpack.c.bf16 %v1906_v15, %v1904_v14 }
  0x10   :  { %1621 = vmatpush3.bf16.msra.mxu0 %v1620_v45  ;;  %1356 = vmatprep.mubr.msk.f32.mxu0 %vm1843_vm0, %v1844_v8  ;;  %v1704_v0 = vpack.c.bf16 %v2031_v62, %v2026_v61  ;;  %v577_v9 = vand.u32 4294901760, %v2051_v5  ;;  %v2068_v11 = vsub.f32 %v2009_v55, %v571_v63  ;;  %v580_v29 = vand.u32 4294901760, %v2057_v6  ;;  %p1826_p4 = pnand %p1825_p3, %p1819_p0 }
  0x11   :  { %1622 = vmatprep.subr.bf16.mxu0 %v1842_v3  ;;  %1702 = vmatpush3.bf16.msra.mxu1 %v1701_v60  ;;  %v1707_v10 = vpack.c.bf16 %v2045_v2, %v2040_v1  ;;  %v2073_v28 = vsub.f32 %v2017_v59, %v574_v4  ;;  %v1629_v30 = vpack.c.bf16 %v1915_v18, %v1908_v16  ;;  %v536_v18 = vld [vmem:[%s2360_s3 + $0x68] sm:$0xff]  ;;  %vm1187_vm2 = vcmask 130048  }
  0x12   :  { %1703 = vmatprep.subr.bf16.mxu1 %v1842_v3  ;;  %v2088_v36 = vsub.f32 %v2051_v5, %v577_v9  ;;  %v2093_v37 = vsub.f32 %v2057_v6, %v580_v29  ;;  %v1638_v40 = vpack.c.bf16 %v126_v23, %v119_v22  ;;  %v1641_v41 = vpack.c.bf16 %v140_v26, %v133_v24  ;;  %v537_v23 = vld [vmem:[%s2360_s3 + $0x70] sm:$0xff]  ;;  %v538_v24 = vld [vmem:[%s2360_s3 + $0x78] sm:$0xff] }
  0x13   :  { %v1710_v33 = vpack.c.bf16 %v2073_v28, %v2068_v11  ;;  %v2132_v14 = vpack.c.bf16 %v550_v27, %v547_v20  ;;  %v2151_v12 = vpack.c.bf16 %v562_v54, %v559_v53  ;;  %v2159_v15 = vpack.c.bf16 %v568_v58, %v565_v57 }
  0x14   :  { %1624 = vmatpush3.bf16.msra.mxu0 %v1623_v56  ;;  %v1713_v39 = vpack.c.bf16 %v2093_v37, %v2088_v36  ;;  %v2167_v16 = vpack.c.bf16 %v574_v4, %v571_v63  ;;  %v586_v20 = vand.u32 4294901760, %v536_v18  ;;  %v589_v26 = vand.u32 4294901760, %v537_v23  ;;  %v1203_v4 = vld [vmem:[%s2359_s2] ss:$0 sm:$0xff] }
  0x15   :  { %1625 = vmatprep.subr.bf16.mxu0 %v1842_v3  ;;  %1705 = vmatpush3.bf16.msra.mxu1 %v1704_v0  ;;  %v592_v27 = vand.u32 4294901760, %v538_v24  ;;  %v2188_v31 = vpack.c.bf16 %v580_v29, %v577_v9  ;;  %v640_v5 = vand.u32 4294901760, %v1953_v34  ;;  %v647_v6 = vand.u32 4294901760, %v1964_v38 }
  0x16   :  { %1706 = vmatprep.subr.bf16.mxu1 %v1842_v3  ;;  %v730_v22 = vsub.f32 %v536_v18, %v586_v20 }
  0x17   :  { %1357 = vmatmul.mubr.f32.vlgmr.msra.gmra.mrb[0].mxu0 %v1917_v19  ;;  %v744_v35 = vsub.f32 %v538_v24, %v592_v27  ;;  %v2198_v44 = vpack.c.bf16 %v592_v27, %v589_v26 }
  0x18   :  { %1627 = vmatpush3.bf16.msra.mxu0 %v1626_v7  ;;  %1367 = vmatprep.mubr.msk.f32.mxu0 %vm1843_vm0, %v1844_v8  ;;  %v731_v46 = vand.u32 4294901760, %v730_v22 }
  0x19   :  { %1628 = vmatprep.subr.bf16.mxu0 %v1842_v3  ;;  %1708 = vmatpush3.bf16.msra.mxu1 %v1707_v10  ;;  %v745_v54 = vand.u32 4294901760, %v744_v35 }
  0x1a   :  { %1709 = vmatprep.subr.bf16.mxu1 %v1842_v3  ;;  %v732_v48 = vsub.f32 %v730_v22, %v731_v46 }
  0x1b   :  { %v746_v57 = vsub.f32 %v744_v35, %v745_v54 }
  0x1c   :  { %1630 = vmatpush3.bf16.msra.mxu0 %v1629_v30  ;;  %v733_v50 = vand.u32 4294901760, %v732_v48  ;;  %v641_v30 = vsub.f32 %v1953_v34, %v640_v5 }
  0x1d   :  { %1631 = vmatprep.subr.bf16.mxu0 %v1842_v3  ;;  %1711 = vmatpush3.bf16.msra.mxu1 %v1710_v33  ;;  %v747_v59 = vand.u32 4294901760, %v746_v57  ;;  %v648_v33 = vsub.f32 %v1964_v38, %v647_v6  ;;  %v703_v57 = vand.u32 4294901760, %v2073_v28 }
  0x1e   :  { %1712 = vmatprep.subr.bf16.mxu1 %v1842_v3 }
  0x1f   :  { %1368 = vmatmul.mubr.f32.vlgmr.msra.gmra.mrb[0].mxu0 %v1928_v25 }
  0x20   :  { %1633 = vmatpush3.bf16.msra.mxu0 %v1902_v13  ;;  %1378 = vmatprep.mubr.msk.f32.mxu0 %vm1843_vm0, %v1844_v8 }
  0x21   :  { %1634 = vmatprep.subr.bf16.mxu0 %v1842_v3  ;;  %1714 = vmatpush3.bf16.msra.mxu1 %v1713_v39  ;;  %v654_v39 = vand.u32 4294901760, %v1997_v51 }
  0x22   :  { %1715 = vmatprep.subr.bf16.mxu1 %v1842_v3 }
  0x24   :  { %1636 = vmatpush3.bf16.msra.mxu0 %v1921_v21 }
  0x25   :  { %1637 = vmatprep.subr.bf16.mxu0 %v1842_v3 }
  0x27   :  { %1379 = vmatmul.mubr.f32.vlgmr.msra.gmra.mrb[0].mxu0 %v108_v32  ;;  %v737_v32 = vsub.f32 %v537_v23, %v589_v26 }
  0x28   :  { %1639 = vmatpush3.bf16.msra.mxu0 %v1638_v40  ;;  %1389 = vmatprep.mubr.msk.f32.mxu0 %vm1843_vm0, %v1844_v8  ;;  %v661_v40 = vand.u32 4294901760, %v2002_v52 }
  0x29   :  { %1640 = vmatprep.subr.bf16.mxu0 %v1842_v3  ;;  %v738_v53 = vand.u32 4294901760, %v737_v32 }
  0x2a   :  { %v662_v23 = vsub.f32 %v2002_v52, %v661_v40 }
  0x2b   :  { %v739_v56 = vsub.f32 %v737_v32, %v738_v53  ;;  %v2208_v0 = vpack.c.bf16 %v745_v54, %v738_v53 }
  0x2c   :  { %1642 = vmatpush3.bf16.msra.mxu0 %v1641_v41 }
  0x2d   :  { %1643 = vmatprep.subr.bf16.mxu0 %v1842_v3  ;;  %v740_v58 = vand.u32 4294901760, %v739_v56  ;;  %v696_v56 = vand.u32 4294901760, %v2068_v11 }
  0x2f   :  { %1390 = vmatmul.mubr.f32.vlgmr.msra.gmra.mrb[0].mxu0 %v1917_v19  ;;  %v2204_v60 = vpack.c.bf16 %v747_v59, %v740_v58 }
  0x30   :  { %1645 = vmatpush3.bf16.msra.mxu0 %v1902_v13  ;;  %1400 = vmatprep.mubr.msk.f32.mxu0 %vm1843_vm0, %v1844_v8  ;;  %v2141_v13 = vpack.c.bf16 %v556_v47, %v553_v42  ;;  %v1719_v42 = vpack.c.bf16 %v744_v35, %v737_v32  ;;  %v682_v32 = vand.u32 4294901760, %v2040_v1  ;;  %v689_v35 = vand.u32 4294901760, %v2045_v2 }
  0x31   :  { %1646 = vmatprep.subr.bf16.mxu0 %v1842_v3 }
  0x32   :  { %v690_v53 = vsub.f32 %v2045_v2, %v689_v35  ;;  %v1755_v38 = vpack.c.bf16 %v689_v35, %v682_v32 }
  0x34   :  { %1648 = vmatpush3.bf16.msra.mxu0 %v1921_v21 }
  0x35   :  { %1649 = vmatprep.subr.bf16.mxu0 %v1842_v3 }
  0x37   :  { %1401 = vmatmul.mubr.f32.vlgmr.msra.gmra.mrb[0].mxu0 %v1917_v19  ;;  %v583_v19 = vand.u32 4294901760, %v535_v17 }
  0x38   :  { %1651 = vmatpush3.bf16.msra.mxu0 %v2132_v14  ;;  %1435 = vmatprep.mubr.msk.f32.mxu0 %vm1843_vm0, %v1844_v8 }
  0x39   :  { %1652 = vmatprep.subr.bf16.mxu0 %v1842_v3  ;;  %v723_v21 = vsub.f32 %v535_v17, %v583_v19  ;;  %v2193_v43 = vpack.c.bf16 %v586_v20, %v583_v19  ;;  %v668_v17 = vand.u32 4294901760, %v2026_v61  ;;  %v675_v19 = vand.u32 4294901760, %v2031_v62 }
  0x3a   :  { %v642_v20 = vand.u32 4294901760, %v641_v30 }
  0x3b   :  { %v1716_v25 = vpack.c.bf16 %v730_v22, %v723_v21  ;;  %v724_v45 = vand.u32 4294901760, %v723_v21  ;;  %v655_v22 = vsub.f32 %v1997_v51, %v654_v39  ;;  %v676_v27 = vsub.f32 %v2031_v62, %v675_v19  ;;  %v1204_v62 = vld [vmem:[%s2361_s4] ss:$0 sm:$0xff] }
  0x3c   :  { %1654 = vmatpush3.bf16.msra.mxu0 %v2141_v13  ;;  %v1752_v34 = vpack.c.bf16 %v675_v19, %v668_v17  ;;  %v1758_v51 = vpack.c.bf16 %v703_v57, %v696_v56 }
  0x3d   :  { %1655 = vmatprep.subr.bf16.mxu0 %v1842_v3  ;;  %1717 = vmatpush3.bf16.msra.mxu1 %v1716_v25  ;;  %v725_v47 = vsub.f32 %v723_v21, %v724_v45  ;;  %v2206_v63 = vpack.c.bf16 %v731_v46, %v724_v45  ;;  %v649_v21 = vand.u32 4294901760, %v648_v33  ;;  %v669_v25 = vsub.f32 %v2026_v61, %v668_v17 }
  0x3e   :  { %1718 = vmatprep.subr.bf16.mxu1 %v1842_v3  ;;  %v656_v45 = vand.u32 4294901760, %v655_v22  ;;  %v663_v46 = vand.u32 4294901760, %v662_v23 }
  0x3f   :  { %v726_v49 = vand.u32 4294901760, %v725_v47  ;;  %v670_v48 = vand.u32 4294901760, %v669_v25  ;;  %v1749_v25 = vpack.c.bf16 %v661_v40, %v654_v39 }
  0x40   :  { %1657 = vmatpush3.bf16.msra.mxu0 %v2151_v12  ;;  %v1677_v54 = vpack.c.bf16 %v663_v46, %v656_v45 }
  0x41   :  { %1658 = vmatprep.subr.bf16.mxu0 %v1842_v3  ;;  %1720 = vmatpush3.bf16.msra.mxu1 %v1719_v42  ;;  %v2202_v55 = vpack.c.bf16 %v733_v50, %v726_v49  ;;  %v1674_v42 = vpack.c.bf16 %v649_v21, %v642_v20  ;;  %v677_v49 = vand.u32 4294901760, %v676_v27  ;;  %v683_v50 = vsub.f32 %v2040_v1, %v682_v32 }
  0x42   :  { %1721 = vmatprep.subr.bf16.mxu1 %v1842_v3 }
  0x43   :  { %v1680_v58 = vpack.c.bf16 %v677_v49, %v670_v48  ;;  %v684_v59 = vand.u32 4294901760, %v683_v50 }
  0x44   :  { %1660 = vmatpush3.bf16.msra.mxu0 %v2159_v15 }
  0x45   :  { %1661 = vmatprep.subr.bf16.mxu0 %v1842_v3 }
  0x48   :  { %1663 = vmatpush3.bf16.msra.mxu0 %v2167_v16 }
  0x49   :  { %1664 = vmatprep.subr.bf16.mxu0 %v1842_v3 }
  0x4c   :  { %1666 = vmatpush3.bf16.msra.mxu0 %v2188_v31 }
  0x4d   :  { %1667 = vmatprep.subr.bf16.mxu0 %v1842_v3 }
  0x50   :  { %1669 = vmatpush3.bf16.msra.mxu0 %v2193_v43 }
  0x51   :  { %1670 = vmatprep.subr.bf16.mxu0 %v1842_v3 }
  0x54   :  { %1672 = vmatpush3.bf16.msra.mxu0 %v2198_v44 }
  0x55   :  { %1673 = vmatprep.subr.bf16.mxu0 %v1842_v3 }
 0x10a   :  { %v518_v7 = vpop.f32.mrb[0].mxu0 }
 0x10b   :  { %v1793_v9 = vadd.f32 %v1203_v4, %v518_v7  ;;  %v1402_v10 = vpop.f32.mrb[1].mxu0  ;;  %v691_v4 = vand.u32 4294901760, %v690_v53  ;;  %v697_v7 = vsub.f32 %v2068_v11, %v696_v56 }
 0x10c   :  { %v710_v10 = vand.u32 4294901760, %v2088_v36 }
 0x10d   :  { %v522_v29 = vmax.f32 %v1793_v9, 0.0  ;;  %v704_v9 = vsub.f32 %v2073_v28, %v703_v57  ;;  %v1683_v30 = vpack.c.bf16 %v691_v4, %v684_v59  ;;  %v698_v33 = vand.u32 4294901760, %v697_v7 }
 0x10e   :  { %v711_v21 = vsub.f32 %v2088_v36, %v710_v10 }
 0x10f   :  { %v2223_v41 = vand.u32 4294901760, %v522_v29  ;;  %v705_v20 = vand.u32 4294901760, %v704_v9 }
 0x110   :  { %v712_v22 = vand.u32 4294901760, %v711_v21 }
 0x111   :  { %v2227_v18 = vsub.f32 %v522_v29, %v2223_v41  ;;  %v717_v29 = vand.u32 4294901760, %v2093_v37  ;;  %v1686_v28 = vpack.c.bf16 %v705_v20, %v698_v33 }
 0x113   :  { %v629_v24 = vand.u32 4294901760, %v2227_v18  ;;  %1506 = vmatmul.mubr.f32.vlgmr.msra.gmra.mrb[0].mxu1 %v2227_v18  ;;  %v718_v11 = vsub.f32 %v2093_v37, %v717_v29  ;;  %v1746_v37 = vpack.c.bf16 %v647_v6, %v640_v5  ;;  %v1761_v52 = vpack.c.bf16 %v717_v29, %v710_v10 }
 0x114   :  { %1723 = vmatpush3.bf16.msra.mxu1 %v2132_v14  ;;  %1540 = vmatprep.mubr.msk.f32.mxu1 %vm1843_vm0, %v1844_v8 }
 0x115   :  { %v630_v26 = vsub.f32 %v2227_v18, %v629_v24  ;;  %1724 = vmatprep.subr.bf16.mxu1 %v1842_v3  ;;  %v719_v23 = vand.u32 4294901760, %v718_v11 }
 0x117   :  { %v631_v47 = vand.u32 4294901760, %v630_v26  ;;  %v1689_v36 = vpack.c.bf16 %v719_v23, %v712_v22 }
 0x118   :  { %1726 = vmatpush3.bf16.msra.mxu1 %v2141_v13 }
 0x119   :  { %1436 = vmatmul.mubr.f32.vlgmr.msra.gmra.mrb[2].mxu0 %v631_v47  ;;  %1727 = vmatprep.subr.bf16.mxu1 %v1842_v3 }
 0x11a   :  { %1675 = vmatpush3.bf16.msra.mxu0 %v1674_v42  ;;  %1470 = vmatprep.mubr.msk.f32.mxu0 %vm1843_vm0, %v1844_v8 }
 0x11b   :  { %1676 = vmatprep.subr.bf16.mxu0 %v1842_v3 }
 0x11c   :  { %1729 = vmatpush3.bf16.msra.mxu1 %v2151_v12 }
 0x11d   :  { %1730 = vmatprep.subr.bf16.mxu1 %v1842_v3 }
 0x11e   :  { %1678 = vmatpush3.bf16.msra.mxu0 %v1677_v54 }
 0x11f   :  { %1679 = vmatprep.subr.bf16.mxu0 %v1842_v3 }
 0x120   :  { %1732 = vmatpush3.bf16.msra.mxu1 %v2159_v15 }
 0x121   :  { %1733 = vmatprep.subr.bf16.mxu1 %v1842_v3 }
 0x122   :  { %1681 = vmatpush3.bf16.msra.mxu0 %v1680_v58 }
 0x123   :  { %1682 = vmatprep.subr.bf16.mxu0 %v1842_v3 }
 0x124   :  { %1735 = vmatpush3.bf16.msra.mxu1 %v2167_v16 }
 0x125   :  { %1736 = vmatprep.subr.bf16.mxu1 %v1842_v3 }
 0x126   :  { %1684 = vmatpush3.bf16.msra.mxu0 %v1683_v30 }
 0x127   :  { %1685 = vmatprep.subr.bf16.mxu0 %v1842_v3 }
 0x128   :  { %1738 = vmatpush3.bf16.msra.mxu1 %v2188_v31 }
 0x129   :  { %1739 = vmatprep.subr.bf16.mxu1 %v1842_v3 }
 0x12a   :  { %1687 = vmatpush3.bf16.msra.mxu0 %v1686_v28 }
 0x12b   :  { %1688 = vmatprep.subr.bf16.mxu0 %v1842_v3 }
 0x12c   :  { %1741 = vmatpush3.bf16.msra.mxu1 %v2193_v43 }
 0x12d   :  { %1742 = vmatprep.subr.bf16.mxu1 %v1842_v3 }
 0x12e   :  { %1690 = vmatpush3.bf16.msra.mxu0 %v1689_v36 }
 0x12f   :  { %1691 = vmatprep.subr.bf16.mxu0 %v1842_v3 }
 0x130   :  { %1744 = vmatpush3.bf16.msra.mxu1 %v2198_v44 }
 0x131   :  { %1745 = vmatprep.subr.bf16.mxu1 %v1842_v3 }
 0x132   :  { %1693 = vmatpush3.bf16.msra.mxu0 %v2202_v55 }
 0x133   :  { %1541 = vmatmul.mubr.f32.vlgmr.msra.gmra.mrb[0].mxu1 %v629_v24  ;;  %1694 = vmatprep.subr.bf16.mxu0 %v1842_v3 }
 0x134   :  { %1747 = vmatpush3.bf16.msra.mxu1 %v1746_v37  ;;  %1575 = vmatprep.mubr.msk.f32.mxu1 %vm1843_vm0, %v1844_v8 }
 0x135   :  { %1748 = vmatprep.subr.bf16.mxu1 %v1842_v3 }
 0x136   :  { %1696 = vmatpush3.bf16.msra.mxu0 %v2204_v60 }
 0x138   :  { %1750 = vmatpush3.bf16.msra.mxu1 %v1749_v25 }
 0x139   :  { %1471 = vmatmul.mubr.f32.vlgmr.msra.gmra.mrb[2].mxu0 %v2223_v41  ;;  %1751 = vmatprep.subr.bf16.mxu1 %v1842_v3 }
 0x13c   :  { %1753 = vmatpush3.bf16.msra.mxu1 %v1752_v34 }
 0x13d   :  { %1754 = vmatprep.subr.bf16.mxu1 %v1842_v3 }
 0x140   :  { %1756 = vmatpush3.bf16.msra.mxu1 %v1755_v38 }
 0x141   :  { %1757 = vmatprep.subr.bf16.mxu1 %v1842_v3 }
 0x144   :  { %1759 = vmatpush3.bf16.msra.mxu1 %v1758_v51 }
 0x145   :  { %1760 = vmatprep.subr.bf16.mxu1 %v1842_v3 }
 0x148   :  { %1762 = vmatpush3.bf16.msra.mxu1 %v1761_v52 }
 0x149   :  { %1763 = vmatprep.subr.bf16.mxu1 %v1842_v3 }
 0x14c   :  { %1765 = vmatpush3.bf16.msra.mxu1 %v2206_v63 }
 0x14d   :  { %1766 = vmatprep.subr.bf16.mxu1 %v1842_v3 }
 0x150   :  { %1768 = vmatpush3.bf16.msra.mxu1 %v2208_v0 }
 0x151   :  { %1769 = vmatprep.subr.bf16.mxu1 %v1842_v3 }
 0x153   :  { %1576 = vmatmul.mubr.f32.vlgmr.msra.gmra.mrb[0].mxu1 %v2223_v41 }
 0x154   :  { %1771 = vmatpush3.bf16.msra.mxu1 %v2132_v14  ;;  %1610 = vmatprep.mubr.msk.f32.mxu1 %vm1843_vm0, %v1844_v8 }
 0x155   :  { %1772 = vmatprep.subr.bf16.mxu1 %v1842_v3 }
 0x158   :  { %1774 = vmatpush3.bf16.msra.mxu1 %v2141_v13 }
 0x159   :  { %1775 = vmatprep.subr.bf16.mxu1 %v1842_v3 }
 0x15c   :  { %1777 = vmatpush3.bf16.msra.mxu1 %v2151_v12 }
 0x15d   :  { %1778 = vmatprep.subr.bf16.mxu1 %v1842_v3 }
 0x160   :  { %1780 = vmatpush3.bf16.msra.mxu1 %v2159_v15 }
 0x161   :  { %1781 = vmatprep.subr.bf16.mxu1 %v1842_v3 }
 0x164   :  { %1783 = vmatpush3.bf16.msra.mxu1 %v2167_v16 }
 0x165   :  { %1784 = vmatprep.subr.bf16.mxu1 %v1842_v3 }
 0x168   :  { %1786 = vmatpush3.bf16.msra.mxu1 %v2188_v31 }
 0x169   :  { %1787 = vmatprep.subr.bf16.mxu1 %v1842_v3 }
 0x16c   :  { %1789 = vmatpush3.bf16.msra.mxu1 %v2193_v43 }
 0x16d   :  { %1790 = vmatprep.subr.bf16.mxu1 %v1842_v3 }
 0x170   :  { %1792 = vmatpush3.bf16.msra.mxu1 %v2198_v44 }
 0x173   :  { %1611 = vmatmul.mubr.f32.vlgmr.msra.gmra.mrb[0].mxu1 %v2223_v41 }
 0x20c   :  { %v784_v8 = vpop.f32.mrb[2].mxu0 }
 0x20d   :  { %v1472_v61 = vpop.f32.mrb[3].mxu0  ;;  %v1794_v1 = vadd.f32 %v1204_v62, %v784_v8 }
 0x246   :  { %v1183_v2 = vpop.f32.mrb[0].mxu1 }
 0x247   :  { %v1795_v14 = vadd.f32 %v1794_v1, %v1183_v2  ;;  %v1612_v13 = vpop.f32.mrb[1].mxu1 }
 0x249   :  { %1188 = vst.msk [vmem:[#allocation2] sm:$0xff] %vm1187_vm2, %v1795_v14 }
 0x24a   :  { %1829 = shalt.err (!%p1826_p4)
}
 0x24b   :  { %s1830_s4 = scalar_lea.hbm %s2362_s5, 128 }
 0x24c   :  { %p1831_p5 = scmp.ne.s32.totalorder %s2362_s5, %s1830_s4  ;;  %p1834_p6 = scmp.lt.u32.totalorder %s1830_s4, %s2362_s5 }
 0x24e   :  { %p1836_p7 = pnand %p1834_p6, %p1831_p5 }
 0x250   :  { %1839 = shalt.err (!%p1836_p7)
}
 0x251   :  { %1198 = dma.vmem_to_hbm [thread:$0]  %s1196_s9, 128, %s2362_s5, [#allocation3]  }
 0x252   :  { %1840 = dma.done.wait [#allocation3], 128  }
 0x253   :  { %1841 = vsyncadd [#allocation3], 4294967168 }
 0x254   :  { %1202 = vsyncpa [#allocation3], 1 }

</bundles_post_ra>
